<compile_context>
chip_gen: v5e
topology: v5e:2x2
jax: 0.10.0
libtpu: 0.0.40
codegen_flags: <defaults>
</compile_context>

<pallas_src>
import jax
import jax.numpy as jnp
from jax.experimental import pallas as pl
from jax.experimental.pallas import tpu as pltpu


LANES = 128                 # vreg lane width
_DEFAULT_TILE_ROWS = 512    # (512, 128) f32 = 256 KiB per input buffer
_KERNEL_MIN_BATCH = 1024    # below this, plain XLA beats kernel launch cost


def _fuse_scores_kernel(scal_ref, movie_ref, tv_ref, o_ref):
    # scal_ref : (3,)            SMEM  -> [w_movie, w_tv, bias]
    # movie_ref: (tile_rows,128) VMEM  lane-dense movie-score slab
    # tv_ref   : (tile_rows,128) VMEM  lane-dense tv-score slab
    # o_ref    : (tile_rows,128) VMEM  fused scores (full-lane stores)
    w_movie = scal_ref[0]
    w_tv = scal_ref[1]
    bias = scal_ref[2]
    # Pure VPU: two scalar-broadcast multiplies + adds per vreg.
    o_ref[...] = movie_ref[...] * w_movie + tv_ref[...] * w_tv + bias


def cross_content_linear(x, weight, bias, *, tile_rows=_DEFAULT_TILE_ROWS,
                         min_kernel_batch=_KERNEL_MIN_BATCH):
    """Pallas equivalent of nn.Linear(2, 1) applied to x of shape (B, 2).

    Args:
      x:      (B, 2) float32 — [movie_score, tv_score] per row.
      weight: (1, 2) float32 — PyTorch nn.Linear weight layout.
      bias:   (1,)   float32 — PyTorch nn.Linear bias.
    Returns:
      (B, 1) float32 combined scores.
    """
    B, F = x.shape
    assert F == 2 and weight.shape == (1, 2) and bias.shape == (1,)

    x = x.astype(jnp.float32)
    w = weight.astype(jnp.float32)
    b = bias.astype(jnp.float32)

    if B < min_kernel_batch:
        # 3 flops/row: kernel dispatch + pipeline prologue dominate. Stay in XLA.
        return x @ w.T + b

    # --- lane-dense restructure: (B, 2) -> two (rows, 128) slabs -------------
    tile_rows = max(8, (tile_rows // 8) * 8)      # sublane (8) alignment
    rows = pl.cdiv(B, LANES)
    if rows <= tile_rows:
        tile_rows = rows                          # one grid step, full-dim block
        rows_pad = rows
    else:
        rows_pad = pl.cdiv(rows, tile_rows) * tile_rows
    b_pad = rows_pad * LANES

    xp = x if b_pad == B else jnp.pad(x, ((0, b_pad - B), (0, 0)))
    movie = xp[:, 0].reshape(rows_pad, LANES)     # layout plumbing in XLA
    tv = xp[:, 1].reshape(rows_pad, LANES)
    scalars = jnp.concatenate([w[0], b])          # (3,) = [w0, w1, bias] -> SMEM

    grid = (rows_pad // tile_rows,)
    out = pl.pallas_call(
        _fuse_scores_kernel,
        out_shape=jax.ShapeDtypeStruct((rows_pad, LANES), jnp.float32),
        grid=grid,
        in_specs=[
            pl.BlockSpec(memory_space=pltpu.MemorySpace.SMEM),    # w0, w1, b
            pl.BlockSpec((tile_rows, LANES), lambda i: (i, 0)),   # movie slab
            pl.BlockSpec((tile_rows, LANES), lambda i: (i, 0)),   # tv slab
        ],
        out_specs=pl.BlockSpec((tile_rows, LANES), lambda i: (i, 0)),
        compiler_params=pltpu.CompilerParams(
            # Mem-bound streaming FMA: shard the row-block axis across
            # TensorCores (megacore on v7x / multi-TC parts).
            dimension_semantics=("parallel",),
        ),
    )(scalars, movie, tv)

    # Back to PyTorch layout: (rows_pad, 128) -> (B, 1).
    return out.reshape(b_pad, 1)[:B]


class CombinedRecommenderModelPallas:
    """JAX/Pallas mirror of CombinedRecommenderModel.

    Only `cross_content_linear` has defined weights in the reference module;
    the movie/tv sub-models are external checkpoints with no architecture
    defined in-file, so routing is stubbed.
    """

    def __init__(self, key):
        # nn.Linear(2, 1) default init: U(-1/sqrt(2), 1/sqrt(2)) for W and b.
        k_w, k_b = jax.random.split(key)
        bound = 1.0 / jnp.sqrt(2.0)
        self.w = jax.random.uniform(k_w, (1, 2), jnp.float32, -bound, bound)
        self.b = jax.random.uniform(k_b, (1,), jnp.float32, -bound, bound)

    def forward(self, content_type: str, **kwargs):
        # TODO(synk): movie/tv sub-model forward passes are not defined in the
        # reference source (loaded from .pt paths) and cannot be implemented.
        raise NotImplementedError(
            f"Sub-model routing for content_type={content_type!r} is not "
            "implementable without the checkpoint architectures."
        )

    def combine_scores(self, score_pairs):
        """score_pairs: (B, 2) [movie_score, tv_score] -> (B, 1) fused score."""
        return cross_content_linear(score_pairs, self.w, self.b)


if __name__ == "__main__":
    key = jax.random.PRNGKey(0)
    k_model, k_x_small, k_x_big = jax.random.split(key, 3)

    model = CombinedRecommenderModelPallas(k_model)

    # Tiny batch: fast path bypasses Pallas (launch overhead >> 24 flops).
    x_small = jax.random.normal(k_x_small, (8, 2), dtype=jnp.float32)
    out_small = jax.block_until_ready(model.combine_scores(x_small))
    ref_small = x_small @ model.w.T + model.b
    assert out_small.shape == (8, 1)
    assert jnp.allclose(out_small, ref_small, atol=1e-5, rtol=1e-5)

    # Lane-dense Pallas path: B=2048 -> two (16, 128) slabs, single grid step.
    B = 2048
    x_big = jax.random.normal(k_x_big, (B, 2), dtype=jnp.float32)
    out_big = jax.block_until_ready(model.combine_scores(x_big))
    ref_big = x_big @ model.w.T + model.b
    assert out_big.shape == (B, 1)
    assert jnp.allclose(out_big, ref_big, atol=1e-5, rtol=1e-5)

    print("KERNEL_OK")
</pallas_src>

<mosaic_0001>
module attributes {stable_mosaic.version = 11 : i64} {
  func.func @_fuse_scores_kernel(%arg0: i32, %arg1: memref<3xf32, #tpu.memory_space<smem>>, %arg2: memref<16x128xf32, #tpu.memory_space<vmem>>, %arg3: memref<16x128xf32, #tpu.memory_space<vmem>>, %arg4: memref<16x128xf32, #tpu.memory_space<vmem>>) attributes {dimension_semantics = [#tpu.dimension_semantics<parallel>], iteration_bounds = array<i64: 1>, scalar_prefetch = 0 : i64, scratch_operands = 0 : i64, tpu.core_type = #tpu.core_type<tc>, window_params = [{transform_indices = @transform_0, window_bounds = array<i64: 3>}, {transform_indices = @transform_1, window_bounds = array<i64: 16, 128>}, {transform_indices = @transform_2, window_bounds = array<i64: 16, 128>}, {transform_indices = @transform_3, window_bounds = array<i64: 16, 128>}]} {
    %c0 = arith.constant 0 : index
    %0 = memref.load %arg1[%c0] : memref<3xf32, #tpu.memory_space<smem>>
    %c1 = arith.constant 1 : index
    %1 = memref.load %arg1[%c1] : memref<3xf32, #tpu.memory_space<smem>>
    %c2 = arith.constant 2 : index
    %2 = memref.load %arg1[%c2] : memref<3xf32, #tpu.memory_space<smem>>
    %c0_0 = arith.constant 0 : index
    %c0_1 = arith.constant 0 : index
    %3 = vector.load %arg2[%c0_0, %c0_1] : memref<16x128xf32, #tpu.memory_space<vmem>>, vector<16x128xf32>
    %4 = vector.broadcast %0 : f32 to vector<16x128xf32>
    %5 = arith.mulf %3, %4 : vector<16x128xf32>
    %c0_2 = arith.constant 0 : index
    %c0_3 = arith.constant 0 : index
    %6 = vector.load %arg3[%c0_2, %c0_3] : memref<16x128xf32, #tpu.memory_space<vmem>>, vector<16x128xf32>
    %7 = vector.broadcast %1 : f32 to vector<16x128xf32>
    %8 = arith.mulf %6, %7 : vector<16x128xf32>
    %9 = arith.addf %5, %8 : vector<16x128xf32>
    %10 = vector.broadcast %2 : f32 to vector<16x128xf32>
    %11 = arith.addf %9, %10 : vector<16x128xf32>
    %c0_4 = arith.constant 0 : index
    %c0_5 = arith.constant 0 : index
    %12 = vector.load %arg4[%c0_4, %c0_5] : memref<16x128xf32, #tpu.memory_space<vmem>>, vector<16x128xf32>
    tpu.vector_store %arg4[%c0_4, %c0_5], %11 {strides = array<i32>} : memref<16x128xf32, #tpu.memory_space<vmem>>, vector<16x128xf32>,
    return
  }
  func.func @transform_0(%arg0: i32) -> i32 {
    %c0_i32 = arith.constant 0 : i32
    %c0_i32_0 = arith.constant 0 : i32
    return %c0_i32 : i32
  }
  func.func @transform_1(%arg0: i32) -> (i32, i32) {
    %c0_i32 = arith.constant 0 : i32
    %c0_i32_0 = arith.constant 0 : i32
    return %arg0, %c0_i32 : i32, i32
  }
  func.func @transform_2(%arg0: i32) -> (i32, i32) {
    %c0_i32 = arith.constant 0 : i32
    %c0_i32_0 = arith.constant 0 : i32
    return %arg0, %c0_i32 : i32, i32
  }
  func.func @transform_3(%arg0: i32) -> (i32, i32) {
    %c0_i32 = arith.constant 0 : i32
    %c0_i32_0 = arith.constant 0 : i32
    return %arg0, %c0_i32 : i32, i32
  }
}

</mosaic_0001>

<bundles_post_ra>
// kernel: tpu_custom_call.1
= control target key start
LH: loop header
LB: loop body
LE: loop exit
PB: predicated region body
PF: predicated region fallthrough
CT: control target
= control target key end

     0   :  { %8 = vsyncpa [#allocation5], 0  ;;  %s248_s0 = inlined_call_operand.hbm [shape: f32[3], index: 0, kind: input, shape index: {}]   ;;  %s249_s1 = inlined_call_operand.hbm [shape: f32[16,128], index: 1, kind: input, shape index: {}]   ;;  %s250_s2 = inlined_call_operand.hbm [shape: f32[16,128], index: 2, kind: input, shape index: {}]   ;;  %s251_s3 = inlined_call_operand.hbm [shape: f32[16,128], index: 3, kind: output, shape index: {}]  }
   0x1   :  { %9 = vsyncpa [#allocation3], 0 }
   0x2   :  { %10 = vsyncpa [#allocation8], 0 }
   0x3   :  { %11 = vsyncpa [#allocation4], 0  ;;  %s17_s14 = sshll.u32 %s248_s0, 4  ;;  %s25_s17 = sshll.u32 %s249_s1, 4  ;;  %s18_s14 = int_to_ptr.hbm [resolvable:$true] %s17_s14  ;;  %s26_s17 = int_to_ptr.hbm [resolvable:$true] %s25_s17 }
   0x4   :  { %s201_s18 = smov [#allocation2]   ;;  %s202_s19 = smov [#allocation6]  }
   0x5   :  { %20 = dma.hbm_to_smem %s18_s14, 16, %s201_s18, [#allocation5]  }
   0x6   :  { %s27_s20 = sshll.u32 %s202_s19, 4  ;;  %s203_s21 = smov 128   ;;  %s28_s20 = int_to_ptr.vmem [resolvable:$true] %s27_s20 }
   0x7   :  { %s204_s22 = smov 8   ;;  %s38_s0 = sshll.u32 %s250_s2, 4  ;;  %s39_s0 = int_to_ptr.hbm [resolvable:$true] %s38_s0 }
   0x8   :  { %33 = dma.hbm_to_vmem [thread:$0]  %s26_s17, 256, %s28_s20, [#allocation3], %s203_s21, %s203_s21, %s204_s22  }
   0x9   :  { %s205_s25 = smov [#allocation7]  }
   0xa   :  { %s40_s26 = sshll.u32 %s205_s25, 4  ;;  %s41_s26 = int_to_ptr.vmem [resolvable:$true] %s40_s26 }
   0xb   :  { %46 = dma.hbm_to_vmem [thread:$0]  %s39_s0, 256, %s41_s26, [#allocation8], %s203_s21, %s203_s21, %s204_s22  }
   0xc   :  { %193 = dma.done.wait [#allocation5], 16  }
   0xd   :  { %194 = vsyncadd [#allocation5], 4294967280 }
   0xe   :  { %195 = dma.done.wait [#allocation3], 256  }
   0xf   :  { %196 = vsyncadd [#allocation3], 4294967040 }
  0x10   :  { %197 = dma.done.wait [#allocation8], 256  }
  0x11   :  { %198 = vsyncadd [#allocation8], 4294967040 }
  0x12   :  { %59 = sfence }
  0x13   :  { %s60_s1 = sld [smem:[#allocation2]]  ;;  %v63_v0 = vld [vmem:[#allocation6] sm:$0xff]  ;;  %v64_v1 = vld [vmem:[#allocation6 + $0x8] sm:$0xff]  ;;  %v68_v2 = vld [vmem:[#allocation7] sm:$0xff]  ;;  %s206_s2 = smov [#allocation9]  }
  0x14   :  { %s101_s27 = sld [smem:[#allocation2 + $0x1]]  ;;  %v69_v3 = vld [vmem:[#allocation7 + $0x8] sm:$0xff]  ;;  %s84_s29 = sshll.u32 %s206_s2, 4  ;;  %s85_s29 = int_to_ptr.vmem [resolvable:$true] %s84_s29 }
  0x15   :  { %s102_s28 = sld [smem:[#allocation2 + $0x2]]  ;;  %s86_s5 = sshll.u32 %s251_s3, 4  ;;  %s87_s5 = int_to_ptr.hbm [resolvable:$true] %s86_s5 }
  0x19   :  { %v65_v4 = vstv %s60_s1 }
  0x1a   :  { %v66_v5 = vmul.f32 %v65_v4, %v63_v0  ;;  %v70_v6 = vstv %s101_s27  ;;  %v67_v7 = vmul.f32 %v65_v4, %v64_v1 }
  0x1b   :  { %v71_v8 = vmul.f32 %v70_v6, %v68_v2  ;;  %v72_v9 = vmul.f32 %v70_v6, %v69_v3  ;;  %v75_v10 = vstv %s102_s28 }
  0x1d   :  { %v73_v11 = vadd.f32 %v71_v8, %v66_v5  ;;  %v74_v12 = vadd.f32 %v72_v9, %v67_v7 }
  0x1f   :  { %v76_v13 = vadd.f32 %v75_v10, %v73_v11  ;;  %v77_v14 = vadd.f32 %v75_v10, %v74_v12 }
  0x21   :  { %78 = vst [vmem:[#allocation9] sm:$0xff] %v76_v13 }
  0x22   :  { %79 = vst [vmem:[#allocation9 + $0x8] sm:$0xff] %v77_v14 }
  0x23   :  { %92 = dma.vmem_to_hbm [thread:$0]  %s85_s29, 256, %s87_s5, [#allocation4], %s203_s21, %s203_s21, %s204_s22  }
  0x24   :  { %199 = dma.done.wait [#allocation4], 256  }
  0x25   :  { %200 = vsyncadd [#allocation4], 4294967040 }
  0x26   :  { %97 = vsyncpa [#allocation3], 1 }
  0x27   :  { %98 = vsyncpa [#allocation8], 1 }
  0x28   :  { %99 = vsyncpa [#allocation4], 1 }
  0x29   :  { %100 = vsyncpa [#allocation5], 1 }

</bundles_post_ra>
